<compile_context>
chip_gen: v7x
topology: tpu7x:2x2x1
jax: 0.10.0
libtpu: 0.0.40
codegen_flags: <defaults>
</compile_context>

<pallas_src>
import jax
import jax.numpy as jnp
from jax.experimental import pallas as pl
from jax.experimental.pallas import tpu as pltpu


def _identity_kernel(x_ref, o_ref):
    # TODO(synk): Model.forward is `pass` (returns None) — there is no real
    # compute to translate; this identity copy only exercises the Pallas path.
    o_ref[...] = x_ref[...]


def _pallas_identity(x):
    """Test-only Pallas identity: whole array in VMEM, no grid, aliased output."""
    return pl.pallas_call(
        _identity_kernel,
        out_shape=jax.ShapeDtypeStruct(x.shape, x.dtype),
        in_specs=[pl.BlockSpec(memory_space=pltpu.MemorySpace.VMEM)],
        out_specs=pl.BlockSpec(memory_space=pltpu.MemorySpace.VMEM),
        input_output_aliases={0: 0},  # output HBM buffer aliases the input
    )(x)


class ModelPallas:
    """JAX/Pallas port of the (empty) PyTorch Model."""

    def __init__(self, params=None):
        # Original __init__ creates no parameters.
        pass

    def forward(self):
        # Original forward() takes no inputs, does no work, and returns None.
        # No Pallas kernel is launched here (dead code w.r.t. the model).
        return None

    __call__ = forward


if __name__ == "__main__":
    key = jax.random.PRNGKey(0)

    # Run the (empty) model forward — faithful to the PyTorch semantics.
    model = ModelPallas({})
    result = model()
    assert result is None  # matches torch Model.forward() returning None

    # Exercise the simplified Pallas identity kernel once (test-only path).
    # Lane-dense shape: 256 rows (mult. of 8 sublanes), 512 cols (mult. of 128
    # lanes) -> unmasked vector stores; 512 KiB fits VMEM on every chip.
    shape, dtype = (256, 512), jnp.float32
    x = jax.random.normal(key, shape, dtype=dtype)
    # Independent reference (same key -> identical values); needed because the
    # input buffer may be donated via input_output_aliases.
    expected = jax.random.normal(key, shape, dtype=dtype)

    y = _pallas_identity(x)
    jax.block_until_ready(y)
    assert y.shape == shape and y.dtype == dtype
    assert jnp.allclose(y, expected)

    print("KERNEL_OK")
</pallas_src>

<mosaic_0001>
module attributes {stable_mosaic.version = 11 : i64} {
  func.func @_identity_kernel(%arg0: memref<256x512xf32, #tpu.memory_space<vmem>>, %arg1: memref<256x512xf32, #tpu.memory_space<vmem>>) attributes {dimension_semantics = [], scalar_prefetch = 0 : i64, scratch_operands = 0 : i64, tpu.core_type = #tpu.core_type<tc>} {
    %c0 = arith.constant 0 : index
    %c0_0 = arith.constant 0 : index
    %0 = vector.load %arg0[%c0, %c0_0] : memref<256x512xf32, #tpu.memory_space<vmem>>, vector<256x512xf32>
    %c0_1 = arith.constant 0 : index
    %c0_2 = arith.constant 0 : index
    %1 = vector.load %arg1[%c0_1, %c0_2] : memref<256x512xf32, #tpu.memory_space<vmem>>, vector<256x512xf32>
    tpu.vector_store %arg1[%c0_1, %c0_2], %0 {strides = array<i32>} : memref<256x512xf32, #tpu.memory_space<vmem>>, vector<256x512xf32>,
    return
  }
}

</mosaic_0001>

<bundles_post_ra>
// kernel: tpu_custom_call.1
= control target key start
LH: loop header
LB: loop body
LE: loop exit
PB: predicated region body
PF: predicated region fallthrough
CT: control target
= control target key end

     0   :  { %6 = vsyncpa [#allocation3], 0  ;;  %s392_s0 = inlined_call_operand.hbm [shape: f32[256,512], index: 0, kind: input, shape index: {}, may-alias: {0,1}]   ;;  %s393_s1 = inlined_call_operand.hbm [shape: f32[256,512], index: 1, kind: output, shape index: {}, may-alias: {0,1}]  }
   0x1   :  { %7 = vsyncpa [#allocation4], 0  ;;  %s348_s6 = smov [#allocation2]   ;;  %s300_s10 = scalar_lea.hbm %s392_s0, 16384 }
   0x2   :  { %s13_s7 = sshll.u32 %s348_s6, 4  ;;  %p301_p0 = scmp.ne.s32.totalorder %s392_s0, %s300_s10  ;;  %s14_s7 = int_to_ptr.vmem [resolvable:$true] %s13_s7 }
   0x3   :  { %p304_p1 = scmp.lt.u32.totalorder %s300_s10, %s392_s0 }
   0x5   :  { %p306_p2 = pnand %p304_p1, %p301_p0 }
   0x7   :  { %309 = shalt.err (!%p306_p2)
}
   0x8   :  { %s310_s15 = scalar_lea.vmem %s14_s7, 16384  ;;  %p315_p4 = scmp.lt.s32.totalorder %s14_s7, %s14_s7 }
   0x9   :  { %p311_p3 = scmp.ne.s32.totalorder %s14_s7, %s310_s15  ;;  %p316_p5 = scmp.lt.s32.totalorder %s310_s15, %s310_s15 }
   0xb   :  { %p317_p6 = por %p316_p5, %p315_p4 }
   0xd   :  { %p318_p7 = pnand %p317_p6, %p311_p3 }
   0xf   :  { %321 = shalt.err (!%p318_p7)
}
  0x10   :  { %s349_s16 = smov 512   ;;  %s350_s17 = smov 32  }
  0x11   :  { %19 = dma.hbm_to_vmem [thread:$0]  %s392_s0, 16384, %s14_s7, [#allocation3], %s349_s16, %s349_s16, %s350_s17  }
  0x12   :  { %344 = dma.done.wait [#allocation3], 16384  }
  0x13   :  { %345 = vsyncadd [#allocation3], 4294950912  ;;  %v23_v0 = vld [vmem:[#allocation2] sm:$0xff]  ;;  %v24_v1 = vld [vmem:[#allocation2 + $0x8] sm:$0xff]  ;;  %s351_s0 = smov [#allocation5]  }
  0x14   :  { %v25_v2 = vld [vmem:[#allocation2 + $0x10] sm:$0xff]  ;;  %151 = vst [vmem:[#allocation5] sm:$0xff] %v23_v0  ;;  %152 = vst [vmem:[#allocation5 + $0x8] sm:$0xff] %v24_v1  ;;  %v26_v3 = vld [vmem:[#allocation2 + $0x18] sm:$0xff]  ;;  %s284_s20 = sshll.u32 %s351_s0, 4  ;;  %s285_s20 = int_to_ptr.vmem [resolvable:$true] %s284_s20 }
  0x15   :  { %153 = vst [vmem:[#allocation5 + $0x10] sm:$0xff] %v25_v2  ;;  %v27_v4 = vld [vmem:[#allocation2 + $0x20] sm:$0xff]  ;;  %v28_v5 = vld [vmem:[#allocation2 + $0x28] sm:$0xff]  ;;  %154 = vst [vmem:[#allocation5 + $0x18] sm:$0xff] %v26_v3  ;;  %s322_s21 = scalar_lea.vmem %s285_s20, 16384  ;;  %p327_p9 = scmp.lt.s32.totalorder %s285_s20, %s285_s20 }
  0x16   :  { %155 = vst [vmem:[#allocation5 + $0x20] sm:$0xff] %v27_v4  ;;  %156 = vst [vmem:[#allocation5 + $0x28] sm:$0xff] %v28_v5  ;;  %v29_v6 = vld [vmem:[#allocation2 + $0x30] sm:$0xff]  ;;  %v30_v7 = vld [vmem:[#allocation2 + $0x38] sm:$0xff]  ;;  %p323_p8 = scmp.ne.s32.totalorder %s285_s20, %s322_s21  ;;  %p328_p10 = scmp.lt.s32.totalorder %s322_s21, %s322_s21 }
  0x17   :  { %v31_v8 = vld [vmem:[#allocation2 + $0x40] sm:$0xff]  ;;  %157 = vst [vmem:[#allocation5 + $0x30] sm:$0xff] %v29_v6  ;;  %158 = vst [vmem:[#allocation5 + $0x38] sm:$0xff] %v30_v7  ;;  %v32_v9 = vld [vmem:[#allocation2 + $0x48] sm:$0xff] }
  0x18   :  { %159 = vst [vmem:[#allocation5 + $0x40] sm:$0xff] %v31_v8  ;;  %v33_v10 = vld [vmem:[#allocation2 + $0x50] sm:$0xff]  ;;  %v34_v11 = vld [vmem:[#allocation2 + $0x58] sm:$0xff]  ;;  %160 = vst [vmem:[#allocation5 + $0x48] sm:$0xff] %v32_v9  ;;  %p329_p11 = por %p328_p10, %p327_p9 }
  0x19   :  { %161 = vst [vmem:[#allocation5 + $0x50] sm:$0xff] %v33_v10  ;;  %162 = vst [vmem:[#allocation5 + $0x58] sm:$0xff] %v34_v11  ;;  %v35_v12 = vld [vmem:[#allocation2 + $0x60] sm:$0xff]  ;;  %v36_v13 = vld [vmem:[#allocation2 + $0x68] sm:$0xff] }
  0x1a   :  { %v37_v14 = vld [vmem:[#allocation2 + $0x70] sm:$0xff]  ;;  %163 = vst [vmem:[#allocation5 + $0x60] sm:$0xff] %v35_v12  ;;  %164 = vst [vmem:[#allocation5 + $0x68] sm:$0xff] %v36_v13  ;;  %v38_v15 = vld [vmem:[#allocation2 + $0x78] sm:$0xff]  ;;  %p330_p12 = pnand %p329_p11, %p323_p8 }
  0x1b   :  { %165 = vst [vmem:[#allocation5 + $0x70] sm:$0xff] %v37_v14  ;;  %v39_v16 = vld [vmem:[#allocation2 + $0x80] sm:$0xff]  ;;  %v40_v17 = vld [vmem:[#allocation2 + $0x88] sm:$0xff]  ;;  %166 = vst [vmem:[#allocation5 + $0x78] sm:$0xff] %v38_v15 }
  0x1c   :  { %167 = vst [vmem:[#allocation5 + $0x80] sm:$0xff] %v39_v16  ;;  %168 = vst [vmem:[#allocation5 + $0x88] sm:$0xff] %v40_v17  ;;  %v41_v18 = vld [vmem:[#allocation2 + $0x90] sm:$0xff]  ;;  %v42_v19 = vld [vmem:[#allocation2 + $0x98] sm:$0xff] }
  0x1d   :  { %v43_v20 = vld [vmem:[#allocation2 + $0xa0] sm:$0xff]  ;;  %169 = vst [vmem:[#allocation5 + $0x90] sm:$0xff] %v41_v18  ;;  %170 = vst [vmem:[#allocation5 + $0x98] sm:$0xff] %v42_v19  ;;  %v44_v21 = vld [vmem:[#allocation2 + $0xa8] sm:$0xff] }
  0x1e   :  { %171 = vst [vmem:[#allocation5 + $0xa0] sm:$0xff] %v43_v20  ;;  %v45_v22 = vld [vmem:[#allocation2 + $0xb0] sm:$0xff]  ;;  %v46_v23 = vld [vmem:[#allocation2 + $0xb8] sm:$0xff]  ;;  %172 = vst [vmem:[#allocation5 + $0xa8] sm:$0xff] %v44_v21 }
  0x1f   :  { %173 = vst [vmem:[#allocation5 + $0xb0] sm:$0xff] %v45_v22  ;;  %174 = vst [vmem:[#allocation5 + $0xb8] sm:$0xff] %v46_v23  ;;  %v47_v24 = vld [vmem:[#allocation2 + $0xc0] sm:$0xff]  ;;  %v48_v25 = vld [vmem:[#allocation2 + $0xc8] sm:$0xff] }
  0x20   :  { %v49_v26 = vld [vmem:[#allocation2 + $0xd0] sm:$0xff]  ;;  %175 = vst [vmem:[#allocation5 + $0xc0] sm:$0xff] %v47_v24  ;;  %176 = vst [vmem:[#allocation5 + $0xc8] sm:$0xff] %v48_v25  ;;  %v50_v27 = vld [vmem:[#allocation2 + $0xd8] sm:$0xff] }
  0x21   :  { %177 = vst [vmem:[#allocation5 + $0xd0] sm:$0xff] %v49_v26  ;;  %v51_v28 = vld [vmem:[#allocation2 + $0xe0] sm:$0xff]  ;;  %v52_v29 = vld [vmem:[#allocation2 + $0xe8] sm:$0xff]  ;;  %178 = vst [vmem:[#allocation5 + $0xd8] sm:$0xff] %v50_v27 }
  0x22   :  { %179 = vst [vmem:[#allocation5 + $0xe0] sm:$0xff] %v51_v28  ;;  %180 = vst [vmem:[#allocation5 + $0xe8] sm:$0xff] %v52_v29  ;;  %v53_v30 = vld [vmem:[#allocation2 + $0xf0] sm:$0xff]  ;;  %v54_v31 = vld [vmem:[#allocation2 + $0xf8] sm:$0xff] }
  0x23   :  { %v55_v32 = vld [vmem:[#allocation2 + $0x100] sm:$0xff]  ;;  %181 = vst [vmem:[#allocation5 + $0xf0] sm:$0xff] %v53_v30  ;;  %182 = vst [vmem:[#allocation5 + $0xf8] sm:$0xff] %v54_v31  ;;  %v56_v33 = vld [vmem:[#allocation2 + $0x108] sm:$0xff] }
  0x24   :  { %183 = vst [vmem:[#allocation5 + $0x100] sm:$0xff] %v55_v32  ;;  %v57_v34 = vld [vmem:[#allocation2 + $0x110] sm:$0xff]  ;;  %v58_v35 = vld [vmem:[#allocation2 + $0x118] sm:$0xff]  ;;  %184 = vst [vmem:[#allocation5 + $0x108] sm:$0xff] %v56_v33 }
  0x25   :  { %185 = vst [vmem:[#allocation5 + $0x110] sm:$0xff] %v57_v34  ;;  %186 = vst [vmem:[#allocation5 + $0x118] sm:$0xff] %v58_v35  ;;  %v59_v36 = vld [vmem:[#allocation2 + $0x120] sm:$0xff]  ;;  %v60_v37 = vld [vmem:[#allocation2 + $0x128] sm:$0xff] }
  0x26   :  { %v61_v38 = vld [vmem:[#allocation2 + $0x130] sm:$0xff]  ;;  %187 = vst [vmem:[#allocation5 + $0x120] sm:$0xff] %v59_v36  ;;  %188 = vst [vmem:[#allocation5 + $0x128] sm:$0xff] %v60_v37  ;;  %v62_v39 = vld [vmem:[#allocation2 + $0x138] sm:$0xff] }
  0x27   :  { %189 = vst [vmem:[#allocation5 + $0x130] sm:$0xff] %v61_v38  ;;  %v63_v40 = vld [vmem:[#allocation2 + $0x140] sm:$0xff]  ;;  %v64_v41 = vld [vmem:[#allocation2 + $0x148] sm:$0xff]  ;;  %190 = vst [vmem:[#allocation5 + $0x138] sm:$0xff] %v62_v39 }
  0x28   :  { %191 = vst [vmem:[#allocation5 + $0x140] sm:$0xff] %v63_v40  ;;  %192 = vst [vmem:[#allocation5 + $0x148] sm:$0xff] %v64_v41  ;;  %v65_v42 = vld [vmem:[#allocation2 + $0x150] sm:$0xff]  ;;  %v66_v43 = vld [vmem:[#allocation2 + $0x158] sm:$0xff] }
  0x29   :  { %v67_v44 = vld [vmem:[#allocation2 + $0x160] sm:$0xff]  ;;  %193 = vst [vmem:[#allocation5 + $0x150] sm:$0xff] %v65_v42  ;;  %194 = vst [vmem:[#allocation5 + $0x158] sm:$0xff] %v66_v43  ;;  %v68_v45 = vld [vmem:[#allocation2 + $0x168] sm:$0xff] }
  0x2a   :  { %195 = vst [vmem:[#allocation5 + $0x160] sm:$0xff] %v67_v44  ;;  %v69_v46 = vld [vmem:[#allocation2 + $0x170] sm:$0xff]  ;;  %v70_v47 = vld [vmem:[#allocation2 + $0x178] sm:$0xff]  ;;  %196 = vst [vmem:[#allocation5 + $0x168] sm:$0xff] %v68_v45 }
  0x2b   :  { %197 = vst [vmem:[#allocation5 + $0x170] sm:$0xff] %v69_v46  ;;  %198 = vst [vmem:[#allocation5 + $0x178] sm:$0xff] %v70_v47  ;;  %v71_v48 = vld [vmem:[#allocation2 + $0x180] sm:$0xff]  ;;  %v72_v49 = vld [vmem:[#allocation2 + $0x188] sm:$0xff] }
  0x2c   :  { %v73_v50 = vld [vmem:[#allocation2 + $0x190] sm:$0xff]  ;;  %199 = vst [vmem:[#allocation5 + $0x180] sm:$0xff] %v71_v48  ;;  %200 = vst [vmem:[#allocation5 + $0x188] sm:$0xff] %v72_v49  ;;  %v74_v51 = vld [vmem:[#allocation2 + $0x198] sm:$0xff] }
  0x2d   :  { %201 = vst [vmem:[#allocation5 + $0x190] sm:$0xff] %v73_v50  ;;  %v75_v52 = vld [vmem:[#allocation2 + $0x1a0] sm:$0xff]  ;;  %v76_v53 = vld [vmem:[#allocation2 + $0x1a8] sm:$0xff]  ;;  %202 = vst [vmem:[#allocation5 + $0x198] sm:$0xff] %v74_v51 }
  0x2e   :  { %203 = vst [vmem:[#allocation5 + $0x1a0] sm:$0xff] %v75_v52  ;;  %204 = vst [vmem:[#allocation5 + $0x1a8] sm:$0xff] %v76_v53  ;;  %v77_v54 = vld [vmem:[#allocation2 + $0x1b0] sm:$0xff]  ;;  %v78_v55 = vld [vmem:[#allocation2 + $0x1b8] sm:$0xff] }
  0x2f   :  { %v79_v56 = vld [vmem:[#allocation2 + $0x1c0] sm:$0xff]  ;;  %205 = vst [vmem:[#allocation5 + $0x1b0] sm:$0xff] %v77_v54  ;;  %206 = vst [vmem:[#allocation5 + $0x1b8] sm:$0xff] %v78_v55  ;;  %v80_v57 = vld [vmem:[#allocation2 + $0x1c8] sm:$0xff] }
  0x30   :  { %207 = vst [vmem:[#allocation5 + $0x1c0] sm:$0xff] %v79_v56  ;;  %v81_v58 = vld [vmem:[#allocation2 + $0x1d0] sm:$0xff]  ;;  %v82_v59 = vld [vmem:[#allocation2 + $0x1d8] sm:$0xff]  ;;  %208 = vst [vmem:[#allocation5 + $0x1c8] sm:$0xff] %v80_v57 }
  0x31   :  { %209 = vst [vmem:[#allocation5 + $0x1d0] sm:$0xff] %v81_v58  ;;  %210 = vst [vmem:[#allocation5 + $0x1d8] sm:$0xff] %v82_v59  ;;  %v83_v60 = vld [vmem:[#allocation2 + $0x1e0] sm:$0xff]  ;;  %v84_v61 = vld [vmem:[#allocation2 + $0x1e8] sm:$0xff] }
  0x32   :  { %v85_v62 = vld [vmem:[#allocation2 + $0x1f0] sm:$0xff]  ;;  %211 = vst [vmem:[#allocation5 + $0x1e0] sm:$0xff] %v83_v60  ;;  %212 = vst [vmem:[#allocation5 + $0x1e8] sm:$0xff] %v84_v61  ;;  %v86_v63 = vld [vmem:[#allocation2 + $0x1f8] sm:$0xff] }
  0x33   :  { %213 = vst [vmem:[#allocation5 + $0x1f0] sm:$0xff] %v85_v62  ;;  %v87_v0 = vld [vmem:[#allocation2 + $0x200] sm:$0xff]  ;;  %v88_v1 = vld [vmem:[#allocation2 + $0x208] sm:$0xff]  ;;  %214 = vst [vmem:[#allocation5 + $0x1f8] sm:$0xff] %v86_v63 }
  0x34   :  { %215 = vst [vmem:[#allocation5 + $0x200] sm:$0xff] %v87_v0  ;;  %216 = vst [vmem:[#allocation5 + $0x208] sm:$0xff] %v88_v1  ;;  %v89_v2 = vld [vmem:[#allocation2 + $0x210] sm:$0xff]  ;;  %v90_v3 = vld [vmem:[#allocation2 + $0x218] sm:$0xff] }
  0x35   :  { %v91_v4 = vld [vmem:[#allocation2 + $0x220] sm:$0xff]  ;;  %217 = vst [vmem:[#allocation5 + $0x210] sm:$0xff] %v89_v2  ;;  %218 = vst [vmem:[#allocation5 + $0x218] sm:$0xff] %v90_v3  ;;  %v92_v5 = vld [vmem:[#allocation2 + $0x228] sm:$0xff] }
  0x36   :  { %219 = vst [vmem:[#allocation5 + $0x220] sm:$0xff] %v91_v4  ;;  %v93_v6 = vld [vmem:[#allocation2 + $0x230] sm:$0xff]  ;;  %v94_v7 = vld [vmem:[#allocation2 + $0x238] sm:$0xff]  ;;  %220 = vst [vmem:[#allocation5 + $0x228] sm:$0xff] %v92_v5 }
  0x37   :  { %221 = vst [vmem:[#allocation5 + $0x230] sm:$0xff] %v93_v6  ;;  %222 = vst [vmem:[#allocation5 + $0x238] sm:$0xff] %v94_v7  ;;  %v95_v8 = vld [vmem:[#allocation2 + $0x240] sm:$0xff]  ;;  %v96_v9 = vld [vmem:[#allocation2 + $0x248] sm:$0xff] }
  0x38   :  { %v97_v10 = vld [vmem:[#allocation2 + $0x250] sm:$0xff]  ;;  %223 = vst [vmem:[#allocation5 + $0x240] sm:$0xff] %v95_v8  ;;  %224 = vst [vmem:[#allocation5 + $0x248] sm:$0xff] %v96_v9  ;;  %v98_v11 = vld [vmem:[#allocation2 + $0x258] sm:$0xff] }
  0x39   :  { %225 = vst [vmem:[#allocation5 + $0x250] sm:$0xff] %v97_v10  ;;  %v99_v12 = vld [vmem:[#allocation2 + $0x260] sm:$0xff]  ;;  %v100_v13 = vld [vmem:[#allocation2 + $0x268] sm:$0xff]  ;;  %226 = vst [vmem:[#allocation5 + $0x258] sm:$0xff] %v98_v11 }
  0x3a   :  { %227 = vst [vmem:[#allocation5 + $0x260] sm:$0xff] %v99_v12  ;;  %228 = vst [vmem:[#allocation5 + $0x268] sm:$0xff] %v100_v13  ;;  %v101_v14 = vld [vmem:[#allocation2 + $0x270] sm:$0xff]  ;;  %v102_v15 = vld [vmem:[#allocation2 + $0x278] sm:$0xff] }
  0x3b   :  { %v103_v16 = vld [vmem:[#allocation2 + $0x280] sm:$0xff]  ;;  %229 = vst [vmem:[#allocation5 + $0x270] sm:$0xff] %v101_v14  ;;  %230 = vst [vmem:[#allocation5 + $0x278] sm:$0xff] %v102_v15  ;;  %v104_v17 = vld [vmem:[#allocation2 + $0x288] sm:$0xff] }
  0x3c   :  { %231 = vst [vmem:[#allocation5 + $0x280] sm:$0xff] %v103_v16  ;;  %v105_v18 = vld [vmem:[#allocation2 + $0x290] sm:$0xff]  ;;  %v106_v19 = vld [vmem:[#allocation2 + $0x298] sm:$0xff]  ;;  %232 = vst [vmem:[#allocation5 + $0x288] sm:$0xff] %v104_v17 }
  0x3d   :  { %233 = vst [vmem:[#allocation5 + $0x290] sm:$0xff] %v105_v18  ;;  %234 = vst [vmem:[#allocation5 + $0x298] sm:$0xff] %v106_v19  ;;  %v107_v20 = vld [vmem:[#allocation2 + $0x2a0] sm:$0xff]  ;;  %v108_v21 = vld [vmem:[#allocation2 + $0x2a8] sm:$0xff] }
  0x3e   :  { %v109_v22 = vld [vmem:[#allocation2 + $0x2b0] sm:$0xff]  ;;  %235 = vst [vmem:[#allocation5 + $0x2a0] sm:$0xff] %v107_v20  ;;  %236 = vst [vmem:[#allocation5 + $0x2a8] sm:$0xff] %v108_v21  ;;  %v110_v23 = vld [vmem:[#allocation2 + $0x2b8] sm:$0xff] }
  0x3f   :  { %237 = vst [vmem:[#allocation5 + $0x2b0] sm:$0xff] %v109_v22  ;;  %v111_v24 = vld [vmem:[#allocation2 + $0x2c0] sm:$0xff]  ;;  %v112_v25 = vld [vmem:[#allocation2 + $0x2c8] sm:$0xff]  ;;  %238 = vst [vmem:[#allocation5 + $0x2b8] sm:$0xff] %v110_v23 }
  0x40   :  { %239 = vst [vmem:[#allocation5 + $0x2c0] sm:$0xff] %v111_v24  ;;  %240 = vst [vmem:[#allocation5 + $0x2c8] sm:$0xff] %v112_v25  ;;  %v113_v26 = vld [vmem:[#allocation2 + $0x2d0] sm:$0xff]  ;;  %v114_v27 = vld [vmem:[#allocation2 + $0x2d8] sm:$0xff] }
  0x41   :  { %v115_v28 = vld [vmem:[#allocation2 + $0x2e0] sm:$0xff]  ;;  %241 = vst [vmem:[#allocation5 + $0x2d0] sm:$0xff] %v113_v26  ;;  %242 = vst [vmem:[#allocation5 + $0x2d8] sm:$0xff] %v114_v27  ;;  %v116_v29 = vld [vmem:[#allocation2 + $0x2e8] sm:$0xff] }
  0x42   :  { %243 = vst [vmem:[#allocation5 + $0x2e0] sm:$0xff] %v115_v28  ;;  %v117_v30 = vld [vmem:[#allocation2 + $0x2f0] sm:$0xff]  ;;  %v118_v31 = vld [vmem:[#allocation2 + $0x2f8] sm:$0xff]  ;;  %244 = vst [vmem:[#allocation5 + $0x2e8] sm:$0xff] %v116_v29 }
  0x43   :  { %245 = vst [vmem:[#allocation5 + $0x2f0] sm:$0xff] %v117_v30  ;;  %246 = vst [vmem:[#allocation5 + $0x2f8] sm:$0xff] %v118_v31  ;;  %v119_v32 = vld [vmem:[#allocation2 + $0x300] sm:$0xff]  ;;  %v120_v33 = vld [vmem:[#allocation2 + $0x308] sm:$0xff] }
  0x44   :  { %v121_v34 = vld [vmem:[#allocation2 + $0x310] sm:$0xff]  ;;  %247 = vst [vmem:[#allocation5 + $0x300] sm:$0xff] %v119_v32  ;;  %248 = vst [vmem:[#allocation5 + $0x308] sm:$0xff] %v120_v33  ;;  %v122_v35 = vld [vmem:[#allocation2 + $0x318] sm:$0xff] }
  0x45   :  { %249 = vst [vmem:[#allocation5 + $0x310] sm:$0xff] %v121_v34  ;;  %v123_v36 = vld [vmem:[#allocation2 + $0x320] sm:$0xff]  ;;  %v124_v37 = vld [vmem:[#allocation2 + $0x328] sm:$0xff]  ;;  %250 = vst [vmem:[#allocation5 + $0x318] sm:$0xff] %v122_v35 }
  0x46   :  { %251 = vst [vmem:[#allocation5 + $0x320] sm:$0xff] %v123_v36  ;;  %252 = vst [vmem:[#allocation5 + $0x328] sm:$0xff] %v124_v37  ;;  %v125_v38 = vld [vmem:[#allocation2 + $0x330] sm:$0xff]  ;;  %v126_v39 = vld [vmem:[#allocation2 + $0x338] sm:$0xff] }
  0x47   :  { %v127_v40 = vld [vmem:[#allocation2 + $0x340] sm:$0xff]  ;;  %253 = vst [vmem:[#allocation5 + $0x330] sm:$0xff] %v125_v38  ;;  %254 = vst [vmem:[#allocation5 + $0x338] sm:$0xff] %v126_v39  ;;  %v128_v41 = vld [vmem:[#allocation2 + $0x348] sm:$0xff] }
  0x48   :  { %255 = vst [vmem:[#allocation5 + $0x340] sm:$0xff] %v127_v40  ;;  %v129_v42 = vld [vmem:[#allocation2 + $0x350] sm:$0xff]  ;;  %v130_v43 = vld [vmem:[#allocation2 + $0x358] sm:$0xff]  ;;  %256 = vst [vmem:[#allocation5 + $0x348] sm:$0xff] %v128_v41 }
  0x49   :  { %257 = vst [vmem:[#allocation5 + $0x350] sm:$0xff] %v129_v42  ;;  %258 = vst [vmem:[#allocation5 + $0x358] sm:$0xff] %v130_v43  ;;  %v131_v44 = vld [vmem:[#allocation2 + $0x360] sm:$0xff]  ;;  %v132_v45 = vld [vmem:[#allocation2 + $0x368] sm:$0xff] }
  0x4a   :  { %v133_v46 = vld [vmem:[#allocation2 + $0x370] sm:$0xff]  ;;  %259 = vst [vmem:[#allocation5 + $0x360] sm:$0xff] %v131_v44  ;;  %260 = vst [vmem:[#allocation5 + $0x368] sm:$0xff] %v132_v45  ;;  %v134_v47 = vld [vmem:[#allocation2 + $0x378] sm:$0xff] }
  0x4b   :  { %261 = vst [vmem:[#allocation5 + $0x370] sm:$0xff] %v133_v46  ;;  %v135_v48 = vld [vmem:[#allocation2 + $0x380] sm:$0xff]  ;;  %v136_v49 = vld [vmem:[#allocation2 + $0x388] sm:$0xff]  ;;  %262 = vst [vmem:[#allocation5 + $0x378] sm:$0xff] %v134_v47 }
  0x4c   :  { %263 = vst [vmem:[#allocation5 + $0x380] sm:$0xff] %v135_v48  ;;  %264 = vst [vmem:[#allocation5 + $0x388] sm:$0xff] %v136_v49  ;;  %v137_v50 = vld [vmem:[#allocation2 + $0x390] sm:$0xff]  ;;  %v138_v51 = vld [vmem:[#allocation2 + $0x398] sm:$0xff] }
  0x4d   :  { %v139_v52 = vld [vmem:[#allocation2 + $0x3a0] sm:$0xff]  ;;  %265 = vst [vmem:[#allocation5 + $0x390] sm:$0xff] %v137_v50  ;;  %266 = vst [vmem:[#allocation5 + $0x398] sm:$0xff] %v138_v51  ;;  %v140_v53 = vld [vmem:[#allocation2 + $0x3a8] sm:$0xff] }
  0x4e   :  { %267 = vst [vmem:[#allocation5 + $0x3a0] sm:$0xff] %v139_v52  ;;  %v141_v54 = vld [vmem:[#allocation2 + $0x3b0] sm:$0xff]  ;;  %v142_v55 = vld [vmem:[#allocation2 + $0x3b8] sm:$0xff]  ;;  %268 = vst [vmem:[#allocation5 + $0x3a8] sm:$0xff] %v140_v53 }
  0x4f   :  { %269 = vst [vmem:[#allocation5 + $0x3b0] sm:$0xff] %v141_v54  ;;  %270 = vst [vmem:[#allocation5 + $0x3b8] sm:$0xff] %v142_v55  ;;  %v143_v56 = vld [vmem:[#allocation2 + $0x3c0] sm:$0xff]  ;;  %v144_v57 = vld [vmem:[#allocation2 + $0x3c8] sm:$0xff] }
  0x50   :  { %v145_v58 = vld [vmem:[#allocation2 + $0x3d0] sm:$0xff]  ;;  %271 = vst [vmem:[#allocation5 + $0x3c0] sm:$0xff] %v143_v56  ;;  %272 = vst [vmem:[#allocation5 + $0x3c8] sm:$0xff] %v144_v57  ;;  %v146_v59 = vld [vmem:[#allocation2 + $0x3d8] sm:$0xff] }
  0x51   :  { %273 = vst [vmem:[#allocation5 + $0x3d0] sm:$0xff] %v145_v58  ;;  %v147_v60 = vld [vmem:[#allocation2 + $0x3e0] sm:$0xff]  ;;  %v148_v61 = vld [vmem:[#allocation2 + $0x3e8] sm:$0xff]  ;;  %274 = vst [vmem:[#allocation5 + $0x3d8] sm:$0xff] %v146_v59 }
  0x52   :  { %275 = vst [vmem:[#allocation5 + $0x3e0] sm:$0xff] %v147_v60  ;;  %276 = vst [vmem:[#allocation5 + $0x3e8] sm:$0xff] %v148_v61  ;;  %v149_v62 = vld [vmem:[#allocation2 + $0x3f0] sm:$0xff]  ;;  %v150_v63 = vld [vmem:[#allocation2 + $0x3f8] sm:$0xff] }
  0x53   :  { %277 = vst [vmem:[#allocation5 + $0x3f0] sm:$0xff] %v149_v62  ;;  %278 = vst [vmem:[#allocation5 + $0x3f8] sm:$0xff] %v150_v63 }
  0x54   :  { %333 = shalt.err (!%p330_p12)
}
  0x55   :  { %s334_s24 = scalar_lea.hbm %s393_s1, 16384 }
  0x56   :  { %p335_p13 = scmp.ne.s32.totalorder %s393_s1, %s334_s24  ;;  %p338_p0 = scmp.lt.u32.totalorder %s334_s24, %s393_s1 }
  0x58   :  { %p340_p1 = pnand %p338_p0, %p335_p13 }
  0x5a   :  { %343 = shalt.err (!%p340_p1)
}
  0x5b   :  { %290 = dma.vmem_to_hbm [thread:$0]  %s285_s20, 16384, %s393_s1, [#allocation4], %s349_s16, %s349_s16, %s350_s17  }
  0x5c   :  { %346 = dma.done.wait [#allocation4], 16384  }
  0x5d   :  { %347 = vsyncadd [#allocation4], 4294950912 }
  0x5e   :  { %294 = vsyncpa [#allocation3], 1 }
  0x5f   :  { %295 = vsyncpa [#allocation4], 1 }

</bundles_post_ra>
